<compile_context>
chip_gen: v7x
topology: tpu7x:2x2x1
jax: 0.10.0
libtpu: 0.0.40
codegen_flags: <defaults>
</compile_context>

<pallas_src>
import functools

import jax
import jax.numpy as jnp
from jax.experimental import pallas as pl
from jax.experimental.pallas import tpu as pltpu


def _round_up(n, m):
    return ((n + m - 1) // m) * m


def decoder_kernel(x_ref, w1_ref, b1_ref, w2_ref, b2_ref, w3_ref, b3_ref, o_ref):
    # Layer 1: Linear + ReLU.  bf16 operands -> MXU, f32 accumulate.
    h = jnp.dot(x_ref[...], w1_ref[...], preferred_element_type=jnp.float32)
    h = jnp.maximum(h + b1_ref[...], 0.0)          # bias/ReLU in f32 (VPU)

    # Layer 2: Linear + ReLU.
    h = jnp.dot(h.astype(w2_ref.dtype), w2_ref[...],
                preferred_element_type=jnp.float32)
    h = jnp.maximum(h + b2_ref[...], 0.0)

    # Output layer: Linear -> mu (no activation).
    mu = jnp.dot(h.astype(w3_ref.dtype), w3_ref[...],
                 preferred_element_type=jnp.float32)
    o_ref[...] = (mu + b3_ref[...]).astype(o_ref.dtype)


@functools.partial(jax.jit, static_argnames=("tb_max",))
def decoder_forward(x, params, *, tb_max=512):
    """x: (B, zdim) f32.  params: list of (W, b) with W:(in,out), b:(1,out)."""
    (w1, b1), (w2, b2), (w3, b3) = params
    B, zdim = x.shape
    h1, h2, out_dim = w1.shape[1], w2.shape[1], w3.shape[1]

    # ---- lane-pad feature dims to multiples of 128 (dense vregs / MXU) ----
    zdim_p = _round_up(zdim, 128)
    h1_p = _round_up(h1, 128)
    h2_p = _round_up(h2, 128)
    out_p = _round_up(out_dim, 128)           # 784 -> 896 (7 x 128)

    # ---- batch tiling: large lane-dense tiles, multiple of 8 sublanes ----
    tb = min(tb_max, _round_up(B, 8))
    b_p = _round_up(B, tb)
    grid = (b_p // tb,)

    def pad2(a, rows, cols):
        return jnp.pad(a, ((0, rows - a.shape[0]), (0, cols - a.shape[1])))

    # Activations & weights in bf16 for the MXU / half the HBM traffic;
    # biases stay f32 (added post-accumulation).
    x_p = pad2(x, b_p, zdim_p).astype(jnp.bfloat16)
    w1_p = pad2(w1, zdim_p, h1_p).astype(jnp.bfloat16)
    w2_p = pad2(w2, h1_p, h2_p).astype(jnp.bfloat16)
    w3_p = pad2(w3, h2_p, out_p).astype(jnp.bfloat16)
    b1_p = pad2(b1, 1, h1_p).astype(jnp.float32)
    b2_p = pad2(b2, 1, h2_p).astype(jnp.float32)
    b3_p = pad2(b3, 1, out_p).astype(jnp.float32)

    # ---- cost estimate so XLA schedules the custom call sensibly ----
    flops = 2 * b_p * (zdim_p * h1_p + h1_p * h2_p + h2_p * out_p)
    bytes_accessed = (
        x_p.size * 2
        + (w1_p.size + w2_p.size + w3_p.size) * 2
        + (b1_p.size + b2_p.size + b3_p.size) * 4
        + b_p * out_p * 4
    )

    # ---- VMEM budget: 2x double-buffered x/out tiles + resident weights ----
    vmem_bytes = (
        2 * (tb * zdim_p * 2 + tb * out_p * 4)                 # streamed tiles
        + (w1_p.size + w2_p.size + w3_p.size) * 2              # resident weights
        + (b1_p.size + b2_p.size + b3_p.size) * 4              # resident biases
        + 2 * tb * max(h1_p, h2_p) * 4                         # intermediates
        + (4 << 20)                                            # slack
    )
    vmem_bytes = min(max(vmem_bytes, 16 * 1024 * 1024), 48 * 1024 * 1024)

    out = pl.pallas_call(
        decoder_kernel,
        out_shape=jax.ShapeDtypeStruct((b_p, out_p), jnp.float32),
        grid=grid,
        in_specs=[
            pl.BlockSpec((tb, zdim_p), lambda i: (i, 0)),      # x: batch-tiled
            pl.BlockSpec((zdim_p, h1_p), lambda i: (0, 0)),    # weights/biases:
            pl.BlockSpec((1, h1_p), lambda i: (0, 0)),         # constant index
            pl.BlockSpec((h1_p, h2_p), lambda i: (0, 0)),      # -> VMEM-resident
            pl.BlockSpec((1, h2_p), lambda i: (0, 0)),
            pl.BlockSpec((h2_p, out_p), lambda i: (0, 0)),
            pl.BlockSpec((1, out_p), lambda i: (0, 0)),
        ],
        out_specs=pl.BlockSpec((tb, out_p), lambda i: (i, 0)),
        compiler_params=pltpu.CompilerParams(
            dimension_semantics=("parallel",),                 # 2x on v7x dual TC
            vmem_limit_bytes=int(vmem_bytes),
        ),
        cost_estimate=pl.CostEstimate(
            flops=flops, transcendentals=0, bytes_accessed=bytes_accessed
        ),
    )(x_p, w1_p, b1_p, w2_p, b2_p, w3_p, b3_p)

    # Slice off batch / lane padding.
    return out[:B, :out_dim]


def init_decoder_params(key, zdim, layer_widths, out_dim=784):
    """Deterministic synthetic init mimicking nn.Linear shapes (transposed)."""
    params = []
    in_width = zdim
    widths = list(layer_widths) + [out_dim]
    for out_width in widths:
        kw, kb, key = jax.random.split(key, 3)
        scale = 1.0 / jnp.sqrt(jnp.float32(in_width))
        W = jax.random.uniform(kw, (in_width, out_width), jnp.float32,
                               minval=-scale, maxval=scale)
        b = jax.random.uniform(kb, (1, out_width), jnp.float32,
                               minval=-scale, maxval=scale)
        params.append((W, b))
        in_width = out_width
    return params


def decoder_reference(x, params, dtype=jnp.float32):
    """Plain-JAX reference of Decoder.forward (mu only)."""
    (w1, b1), (w2, b2), (w3, b3) = params
    xa = x.astype(dtype)
    h = jnp.maximum(jnp.dot(xa, w1.astype(dtype),
                            preferred_element_type=jnp.float32) + b1, 0.0)
    h = jnp.maximum(jnp.dot(h.astype(dtype), w2.astype(dtype),
                            preferred_element_type=jnp.float32) + b2, 0.0)
    return jnp.dot(h.astype(dtype), w3.astype(dtype),
                   preferred_element_type=jnp.float32) + b3


if __name__ == "__main__":
    key = jax.random.PRNGKey(0)
    kx, kp, kx2 = jax.random.split(key, 3)

    batch = 8
    zdim = 32
    layer_widths = [64, 128]   # Decoder(zdim=32, layer_widths=[64, 128])

    x = jax.random.normal(kx, (batch, zdim), jnp.float32)
    params = init_decoder_params(kp, zdim, layer_widths)

    # --- small batch, single grid step ---
    mu = jax.block_until_ready(decoder_forward(x, params))
    assert mu.shape == (batch, 784), mu.shape

    # Tight check vs a bf16-weight reference (same MXU dtype path).
    mu_bf16_ref = decoder_reference(x, params, dtype=jnp.bfloat16)
    assert jnp.allclose(mu, mu_bf16_ref, atol=2e-3, rtol=2e-3), "mismatch (bf16 ref)"
    # Looser sanity check vs the full-f32 reference.
    mu_f32_ref = decoder_reference(x, params, dtype=jnp.float32)
    assert jnp.allclose(mu, mu_f32_ref, atol=5e-2, rtol=5e-2), "mismatch (f32 ref)"

    # --- non-multiple batch, multi-step grid (exercises padding + pipeline) ---
    batch2 = 300
    x2 = jax.random.normal(kx2, (batch2, zdim), jnp.float32)
    mu2 = jax.block_until_ready(decoder_forward(x2, params, tb_max=128))
    assert mu2.shape == (batch2, 784), mu2.shape
    mu2_ref = decoder_reference(x2, params, dtype=jnp.bfloat16)
    assert jnp.allclose(mu2, mu2_ref, atol=2e-3, rtol=2e-3), "mismatch (tiled)"

    # TODO(synk): `logsigma` is a learnable scalar unused in Decoder.forward; omitted.
    print("KERNEL_OK")
</pallas_src>

<mosaic_0001>
module attributes {stable_mosaic.version = 11 : i64} {
  func.func @decoder_kernel(%arg0: i32, %arg1: memref<8x128xbf16, #tpu.memory_space<vmem>>, %arg2: memref<128x128xbf16, #tpu.memory_space<vmem>>, %arg3: memref<1x128xf32, #tpu.memory_space<vmem>>, %arg4: memref<128x128xbf16, #tpu.memory_space<vmem>>, %arg5: memref<1x128xf32, #tpu.memory_space<vmem>>, %arg6: memref<128x896xbf16, #tpu.memory_space<vmem>>, %arg7: memref<1x896xf32, #tpu.memory_space<vmem>>, %arg8: memref<8x896xf32, #tpu.memory_space<vmem>>) attributes {dimension_semantics = [#tpu.dimension_semantics<parallel>], iteration_bounds = array<i64: 1>, scalar_prefetch = 0 : i64, scratch_operands = 0 : i64, tpu.core_type = #tpu.core_type<tc>, window_params = [{transform_indices = @transform_0, window_bounds = array<i64: 8, 128>}, {pipeline_mode = #tpu.pipeline_mode<synchronous>, transform_indices = @transform_1, window_bounds = array<i64: 128, 128>}, {pipeline_mode = #tpu.pipeline_mode<synchronous>, transform_indices = @transform_2, window_bounds = array<i64: 1, 128>}, {pipeline_mode = #tpu.pipeline_mode<synchronous>, transform_indices = @transform_3, window_bounds = array<i64: 128, 128>}, {pipeline_mode = #tpu.pipeline_mode<synchronous>, transform_indices = @transform_4, window_bounds = array<i64: 1, 128>}, {pipeline_mode = #tpu.pipeline_mode<synchronous>, transform_indices = @transform_5, window_bounds = array<i64: 128, 896>}, {pipeline_mode = #tpu.pipeline_mode<synchronous>, transform_indices = @transform_6, window_bounds = array<i64: 1, 896>}, {transform_indices = @transform_7, window_bounds = array<i64: 8, 896>}]} {
    %c0 = arith.constant 0 : index
    %c0_0 = arith.constant 0 : index
    %0 = vector.load %arg1[%c0, %c0_0] : memref<8x128xbf16, #tpu.memory_space<vmem>>, vector<8x128xbf16>
    %c0_1 = arith.constant 0 : index
    %c0_2 = arith.constant 0 : index
    %1 = vector.load %arg2[%c0_1, %c0_2] : memref<128x128xbf16, #tpu.memory_space<vmem>>, vector<128x128xbf16>
    %cst = arith.constant dense<0.000000e+00> : vector<8x128xf32>
    %2 = tpu.matmul %0, %1, %cst {dimension_numbers = #tpu.dot_dimension_numbers<[1], [0], [0], [1], [0, 0, 1, 1], [], []>} : vector<8x128xbf16>, vector<128x128xbf16>, vector<8x128xf32> -> vector<8x128xf32>
    %c0_3 = arith.constant 0 : index
    %c0_4 = arith.constant 0 : index
    %3 = vector.load %arg3[%c0_3, %c0_4] : memref<1x128xf32, #tpu.memory_space<vmem>>, vector<1x128xf32>
    %4 = vector.broadcast %3 : vector<1x128xf32> to vector<8x128xf32>
    %5 = arith.addf %2, %4 : vector<8x128xf32>
    %cst_5 = arith.constant 0.000000e+00 : f32
    %6 = vector.broadcast %cst_5 : f32 to vector<8x128xf32>
    %7 = arith.maximumf %5, %6 : vector<8x128xf32>
    %8 = arith.truncf %7 : vector<8x128xf32> to vector<8x128xbf16>
    %c0_6 = arith.constant 0 : index
    %c0_7 = arith.constant 0 : index
    %9 = vector.load %arg4[%c0_6, %c0_7] : memref<128x128xbf16, #tpu.memory_space<vmem>>, vector<128x128xbf16>
    %cst_8 = arith.constant dense<0.000000e+00> : vector<8x128xf32>
    %10 = tpu.matmul %8, %9, %cst_8 {dimension_numbers = #tpu.dot_dimension_numbers<[1], [0], [0], [1], [0, 0, 1, 1], [], []>} : vector<8x128xbf16>, vector<128x128xbf16>, vector<8x128xf32> -> vector<8x128xf32>
    %c0_9 = arith.constant 0 : index
    %c0_10 = arith.constant 0 : index
    %11 = vector.load %arg5[%c0_9, %c0_10] : memref<1x128xf32, #tpu.memory_space<vmem>>, vector<1x128xf32>
    %12 = vector.broadcast %11 : vector<1x128xf32> to vector<8x128xf32>
    %13 = arith.addf %10, %12 : vector<8x128xf32>
    %cst_11 = arith.constant 0.000000e+00 : f32
    %14 = vector.broadcast %cst_11 : f32 to vector<8x128xf32>
    %15 = arith.maximumf %13, %14 : vector<8x128xf32>
    %16 = arith.truncf %15 : vector<8x128xf32> to vector<8x128xbf16>
    %c0_12 = arith.constant 0 : index
    %c0_13 = arith.constant 0 : index
    %17 = vector.load %arg6[%c0_12, %c0_13] : memref<128x896xbf16, #tpu.memory_space<vmem>>, vector<128x896xbf16>
    %cst_14 = arith.constant dense<0.000000e+00> : vector<8x896xf32>
    %18 = tpu.matmul %16, %17, %cst_14 {dimension_numbers = #tpu.dot_dimension_numbers<[1], [0], [0], [1], [0, 0, 1, 1], [], []>} : vector<8x128xbf16>, vector<128x896xbf16>, vector<8x896xf32> -> vector<8x896xf32>
    %c0_15 = arith.constant 0 : index
    %c0_16 = arith.constant 0 : index
    %19 = vector.load %arg7[%c0_15, %c0_16] : memref<1x896xf32, #tpu.memory_space<vmem>>, vector<1x896xf32>
    %20 = vector.broadcast %19 : vector<1x896xf32> to vector<8x896xf32>
    %21 = arith.addf %18, %20 : vector<8x896xf32>
    %c0_17 = arith.constant 0 : index
    %c0_18 = arith.constant 0 : index
    %22 = vector.load %arg8[%c0_17, %c0_18] : memref<8x896xf32, #tpu.memory_space<vmem>>, vector<8x896xf32>
    tpu.vector_store %arg8[%c0_17, %c0_18], %21 {strides = array<i32>} : memref<8x896xf32, #tpu.memory_space<vmem>>, vector<8x896xf32>,
    return
  }
  func.func @transform_0(%arg0: i32) -> (i32, i32) {
    %c0_i32 = arith.constant 0 : i32
    %c0_i32_0 = arith.constant 0 : i32
    return %arg0, %c0_i32 : i32, i32
  }
  func.func @transform_1(%arg0: i32) -> (i32, i32) {
    %c0_i32 = arith.constant 0 : i32
    %c0_i32_0 = arith.constant 0 : i32
    %c0_i32_1 = arith.constant 0 : i32
    return %c0_i32, %c0_i32_0 : i32, i32
  }
  func.func @transform_2(%arg0: i32) -> (i32, i32) {
    %c0_i32 = arith.constant 0 : i32
    %c0_i32_0 = arith.constant 0 : i32
    %c0_i32_1 = arith.constant 0 : i32
    return %c0_i32, %c0_i32_0 : i32, i32
  }
  func.func @transform_3(%arg0: i32) -> (i32, i32) {
    %c0_i32 = arith.constant 0 : i32
    %c0_i32_0 = arith.constant 0 : i32
    %c0_i32_1 = arith.constant 0 : i32
    return %c0_i32, %c0_i32_0 : i32, i32
  }
  func.func @transform_4(%arg0: i32) -> (i32, i32) {
    %c0_i32 = arith.constant 0 : i32
    %c0_i32_0 = arith.constant 0 : i32
    %c0_i32_1 = arith.constant 0 : i32
    return %c0_i32, %c0_i32_0 : i32, i32
  }
  func.func @transform_5(%arg0: i32) -> (i32, i32) {
    %c0_i32 = arith.constant 0 : i32
    %c0_i32_0 = arith.constant 0 : i32
    %c0_i32_1 = arith.constant 0 : i32
    return %c0_i32, %c0_i32_0 : i32, i32
  }
  func.func @transform_6(%arg0: i32) -> (i32, i32) {
    %c0_i32 = arith.constant 0 : i32
    %c0_i32_0 = arith.constant 0 : i32
    %c0_i32_1 = arith.constant 0 : i32
    return %c0_i32, %c0_i32_0 : i32, i32
  }
  func.func @transform_7(%arg0: i32) -> (i32, i32) {
    %c0_i32 = arith.constant 0 : i32
    %c0_i32_0 = arith.constant 0 : i32
    return %arg0, %c0_i32 : i32, i32
  }
}

</mosaic_0001>

<bundles_post_ra>
// kernel: decoder_forward.1
= control target key start
LH: loop header
LB: loop body
LE: loop exit
PB: predicated region body
PF: predicated region fallthrough
CT: control target
= control target key end

     0   :  { %v1113_v1 = vmov 0.0   ;;  %vm1114_vm0 = vmmov 0   ;;  %s1427_s0 = inlined_call_operand.vmem [shape: bf16[8,128], index: 0, kind: input, shape index: {}]   ;;  %s1428_s1 = inlined_call_operand.vmem [shape: bf16[128,128], index: 1, kind: input, shape index: {}]   ;;  %s1429_s2 = inlined_call_operand.vmem [shape: f32[1,128], index: 2, kind: input, shape index: {}]   ;;  %s1430_s3 = inlined_call_operand.vmem [shape: bf16[128,128], index: 3, kind: input, shape index: {}]   ;;  %s1431_s4 = inlined_call_operand.vmem [shape: f32[1,128], index: 4, kind: input, shape index: {}]   ;;  %s1432_s5 = inlined_call_operand.vmem [shape: bf16[128,896], index: 5, kind: input, shape index: {}]   ;;  %s1433_s6 = inlined_call_operand.vmem [shape: f32[1,896], index: 6, kind: input, shape index: {}]   ;;  %s1434_s7 = inlined_call_operand.hbm [shape: f32[8,896], index: 7, kind: output, shape index: {}]  }
   0x1   :  { %v993_v0 = vld [vmem:[%s1428_s1] sm:$0xff]   ;;  %929 = vmatprep.subr.bf16.mxu0 %v1113_v1  ;;  %949 = vmatprep.subr.bf16.mxu1 %v1113_v1  ;;  %v994_v2 = vld [vmem:[%s1428_s1 + $0x8] sm:$0xff]   ;;  %v995_v3 = vld [vmem:[%s1428_s1 + $0x10] sm:$0xff]  }
   0x2   :  { %930 = vmatpush3.bf16.msra.mxu0 %v993_v0  ;;  %945 = vmatprep.mubr.msk.bf16.mxu0 %vm1114_vm0, %v1113_v1  ;;  %v1001_v4 = vld [vmem:[%s1430_s3] sm:$0xff]   ;;  %v996_v5 = vld [vmem:[%s1428_s1 + $0x18] sm:$0xff]   ;;  %v1002_v6 = vld [vmem:[%s1430_s3 + $0x8] sm:$0xff]  }
   0x3   :  { %931 = vmatprep.subr.bf16.mxu0 %v1113_v1  ;;  %965 = vmatprep.mubr.msk.bf16.mxu1 %vm1114_vm0, %v1113_v1  ;;  %v997_v7 = vld [vmem:[%s1428_s1 + $0x20] sm:$0xff]   ;;  %v1003_v8 = vld [vmem:[%s1430_s3 + $0x10] sm:$0xff]   ;;  %v998_v9 = vld [vmem:[%s1428_s1 + $0x28] sm:$0xff]  }
   0x4   :  { %950 = vmatpush3.bf16.msra.mxu1 %v1001_v4  ;;  %v1004_v10 = vld [vmem:[%s1430_s3 + $0x18] sm:$0xff]   ;;  %v999_v11 = vld [vmem:[%s1428_s1 + $0x30] sm:$0xff]   ;;  %v1005_v12 = vld [vmem:[%s1430_s3 + $0x20] sm:$0xff]  }
   0x5   :  { %951 = vmatprep.subr.bf16.mxu1 %v1113_v1  ;;  %v1000_v13 = vld [vmem:[%s1428_s1 + $0x38] sm:$0xff]   ;;  %v1006_v14 = vld [vmem:[%s1430_s3 + $0x28] sm:$0xff]   ;;  %v28_v15 = vld [vmem:[%s1427_s0] sm:$0xf] }
   0x6   :  { %932 = vmatpush3.bf16.msra.mxu0 %v994_v2 }
   0x7   :  { %933 = vmatprep.subr.bf16.mxu0 %v1113_v1 }
   0x8   :  { %952 = vmatpush3.bf16.msra.mxu1 %v1002_v6 }
   0x9   :  { %953 = vmatprep.subr.bf16.mxu1 %v1113_v1 }
   0xa   :  { %934 = vmatpush3.bf16.msra.mxu0 %v995_v3 }
   0xb   :  { %935 = vmatprep.subr.bf16.mxu0 %v1113_v1 }
   0xc   :  { %954 = vmatpush3.bf16.msra.mxu1 %v1003_v8 }
   0xd   :  { %955 = vmatprep.subr.bf16.mxu1 %v1113_v1 }
   0xe   :  { %936 = vmatpush3.bf16.msra.mxu0 %v996_v5 }
   0xf   :  { %937 = vmatprep.subr.bf16.mxu0 %v1113_v1 }
  0x10   :  { %956 = vmatpush3.bf16.msra.mxu1 %v1004_v10 }
  0x11   :  { %957 = vmatprep.subr.bf16.mxu1 %v1113_v1 }
  0x12   :  { %938 = vmatpush3.bf16.msra.mxu0 %v997_v7 }
  0x13   :  { %939 = vmatprep.subr.bf16.mxu0 %v1113_v1 }
  0x14   :  { %958 = vmatpush3.bf16.msra.mxu1 %v1005_v12 }
  0x15   :  { %959 = vmatprep.subr.bf16.mxu1 %v1113_v1 }
  0x16   :  { %940 = vmatpush3.bf16.msra.mxu0 %v998_v9 }
  0x17   :  { %941 = vmatprep.subr.bf16.mxu0 %v1113_v1 }
  0x18   :  { %960 = vmatpush3.bf16.msra.mxu1 %v1006_v14 }
  0x19   :  { %961 = vmatprep.subr.bf16.mxu1 %v1113_v1 }
  0x1a   :  { %942 = vmatpush3.bf16.msra.mxu0 %v999_v11 }
  0x1b   :  { %943 = vmatprep.subr.bf16.mxu0 %v1113_v1 }
  0x1e   :  { %944 = vmatpush3.bf16.msra.mxu0 %v1000_v13 }
  0x21   :  { %946 = vmatmul.mubr.bf16.vlgmr.msra.gmra.mrb[0].mxu0 %v28_v15 }
  0x22   :  { %12 = vsyncpa [#allocation3], 0  ;;  %v1007_v16 = vld [vmem:[%s1430_s3 + $0x30] sm:$0xff]   ;;  %v1008_v17 = vld [vmem:[%s1430_s3 + $0x38] sm:$0xff]   ;;  %v1115_v59 = vmov 0  }
  0x23   :  { %962 = vmatpush3.bf16.msra.mxu1 %v1007_v16  ;;  %v1009_v18 = vld [vmem:[%s1432_s5] ss:$28 sps:$4 sm:$0xff]   ;;  %v1014_v20 = vld [vmem:[%s1432_s5 + $0xc] ss:$28 sps:$4 sm:$0xff]   ;;  %v1015_v22 = vld [vmem:[%s1432_s5 + $0x38] ss:$28 sps:$4 sm:$0xff]   ;;  %676 = vmatprep.mubr.bf16.mxu0 %v1115_v59 }
  0x24   :  { %963 = vmatprep.subr.bf16.mxu1 %v1113_v1  ;;  %v1011_v19 = vld [vmem:[%s1432_s5 + $0x4] ss:$28 sps:$4 sm:$0xff]   ;;  %v1017_v21 = vld [vmem:[%s1432_s5 + $0x3c] ss:$28 sps:$4 sm:$0xff]   ;;  %v1023_v23 = vld [vmem:[%s1432_s5 + $0x74] ss:$28 sps:$4 sm:$0xff]  }
  0x25   :  { %644 = vmatprep.subr.bf16.mxu0 %v1011_v19  ;;  %v1021_v24 = vld [vmem:[%s1432_s5 + $0x70] ss:$28 sps:$4 sm:$0xff]   ;;  %v1027_v26 = vld [vmem:[%s1432_s5 + $0xa8] ss:$28 sps:$4 sm:$0xff]   ;;  %v1033_v28 = vld [vmem:[%s1432_s5 + $0xe0] ss:$28 sps:$4 sm:$0xff]  }
  0x26   :  { %645 = vmatpush1.bf16.msra.mxu0 %v1009_v18  ;;  %v1029_v25 = vld [vmem:[%s1432_s5 + $0xac] ss:$28 sps:$4 sm:$0xff]   ;;  %v1035_v27 = vld [vmem:[%s1432_s5 + $0xe4] ss:$28 sps:$4 sm:$0xff]   ;;  %v1041_v29 = vld [vmem:[%s1432_s5 + $0x11c] ss:$28 sps:$4 sm:$0xff]  }
  0x27   :  { %964 = vmatpush3.bf16.msra.mxu1 %v1008_v17  ;;  %646 = vmatprep.subr.bf16.mxu0 %v1017_v21  ;;  %v1039_v30 = vld [vmem:[%s1432_s5 + $0x118] ss:$28 sps:$4 sm:$0xff]   ;;  %v1045_v32 = vld [vmem:[%s1432_s5 + $0x150] ss:$28 sps:$4 sm:$0xff]   ;;  %v828_v33 = vld [vmem:[%s1429_s2] ss:$0 sm:$0xff] }
  0x28   :  { %685 = vmatprep.subr.bf16.mxu1 %v1014_v20  ;;  %v1047_v31 = vld [vmem:[%s1432_s5 + $0x154] ss:$28 sps:$4 sm:$0xff]   ;;  %v1012_v40 = vld [vmem:[%s1432_s5 + $0x8] ss:$28 sps:$4 sm:$0xff]   ;;  %v1018_v43 = vld [vmem:[%s1432_s5 + $0x40] ss:$28 sps:$4 sm:$0xff]  }
  0x29   :  { %v1020_v42 = vld [vmem:[%s1432_s5 + $0x44] ss:$28 sps:$4 sm:$0xff]   ;;  %v1026_v44 = vld [vmem:[%s1432_s5 + $0x7c] ss:$28 sps:$4 sm:$0xff]   ;;  %v1032_v46 = vld [vmem:[%s1432_s5 + $0xb4] ss:$28 sps:$4 sm:$0xff]  }
  0x2a   :  { %647 = vmatpush1.bf16.msra.mxu0 %v1015_v22  ;;  %v1024_v45 = vld [vmem:[%s1432_s5 + $0x78] ss:$28 sps:$4 sm:$0xff]   ;;  %v1030_v47 = vld [vmem:[%s1432_s5 + $0xb0] ss:$28 sps:$4 sm:$0xff]   ;;  %v1036_v49 = vld [vmem:[%s1432_s5 + $0xe8] ss:$28 sps:$4 sm:$0xff]  }
  0x2b   :  { %648 = vmatprep.subr.bf16.mxu0 %v1023_v23  ;;  %v1038_v48 = vld [vmem:[%s1432_s5 + $0xec] ss:$28 sps:$4 sm:$0xff]   ;;  %v1044_v50 = vld [vmem:[%s1432_s5 + $0x124] ss:$28 sps:$4 sm:$0xff]   ;;  %v1050_v52 = vld [vmem:[%s1432_s5 + $0x15c] ss:$28 sps:$4 sm:$0xff]  }
  0x2c   :  { %v1042_v51 = vld [vmem:[%s1432_s5 + $0x120] ss:$28 sps:$4 sm:$0xff]   ;;  %v1048_v53 = vld [vmem:[%s1432_s5 + $0x158] ss:$28 sps:$4 sm:$0xff]   ;;  %v1053_v54 = vld [vmem:[%s1432_s5 + $0x18c] ss:$28 sps:$4 sm:$0xff]  }
  0x2d   :  { %v1056_v55 = vld [vmem:[%s1432_s5 + $0x194] ss:$28 sps:$4 sm:$0xff]   ;;  %v1051_v56 = vld [vmem:[%s1432_s5 + $0x188] ss:$28 sps:$4 sm:$0xff]   ;;  %v837_v60 = vld [vmem:[%s1431_s4] ss:$0 sm:$0xff] }
  0x2e   :  { %649 = vmatpush1.bf16.msra.mxu0 %v1021_v24  ;;  %v1054_v57 = vld [vmem:[%s1432_s5 + $0x190] ss:$28 sps:$4 sm:$0xff]   ;;  %v1060_v5 = vld [vmem:[%s1432_s5 + $0x18] ss:$28 sps:$4 sm:$0xff]   ;;  %v1061_v8 = vld [vmem:[%s1432_s5 + $0x48] ss:$28 sps:$4 sm:$0xff]  }
  0x2f   :  { %650 = vmatprep.subr.bf16.mxu0 %v1029_v25  ;;  %v1059_v58 = vld [vmem:[%s1432_s5 + $0x14] ss:$28 sps:$4 sm:$0xff]   ;;  %v1063_v7 = vld [vmem:[%s1432_s5 + $0x4c] ss:$28 sps:$4 sm:$0xff]   ;;  %v1067_v10 = vld [vmem:[%s1432_s5 + $0x84] ss:$28 sps:$4 sm:$0xff]  }
  0x30   :  { %v1057_v4 = vld [vmem:[%s1432_s5 + $0x10] ss:$28 sps:$4 sm:$0xff]   ;;  %v1065_v11 = vld [vmem:[%s1432_s5 + $0x80] ss:$28 sps:$4 sm:$0xff]   ;;  %v1068_v12 = vld [vmem:[%s1432_s5 + $0x88] ss:$28 sps:$4 sm:$0xff]  }
  0x31   :  { %v1064_v9 = vld [vmem:[%s1432_s5 + $0x50] ss:$28 sps:$4 sm:$0xff]   ;;  %v1071_v13 = vld [vmem:[%s1432_s5 + $0xbc] ss:$28 sps:$4 sm:$0xff]   ;;  %v1077_v20 = vld [vmem:[%s1432_s5 + $0x128] ss:$28 sps:$4 sm:$0xff]  }
  0x32   :  { %651 = vmatpush1.bf16.msra.mxu0 %v1027_v26  ;;  %v1069_v14 = vld [vmem:[%s1432_s5 + $0xb8] ss:$28 sps:$4 sm:$0xff]   ;;  %v1072_v15 = vld [vmem:[%s1432_s5 + $0xc0] ss:$28 sps:$4 sm:$0xff]   ;;  %v1073_v17 = vld [vmem:[%s1432_s5 + $0xf0] ss:$28 sps:$4 sm:$0xff]  }
  0x33   :  { %652 = vmatprep.subr.bf16.mxu0 %v1035_v27  ;;  %v1075_v16 = vld [vmem:[%s1432_s5 + $0xf4] ss:$28 sps:$4 sm:$0xff]   ;;  %v1079_v19 = vld [vmem:[%s1432_s5 + $0x12c] ss:$28 sps:$4 sm:$0xff]   ;;  %v1083_v22 = vld [vmem:[%s1432_s5 + $0x164] ss:$28 sps:$4 sm:$0xff]  }
  0x34   :  { %v1076_v18 = vld [vmem:[%s1432_s5 + $0xf8] ss:$28 sps:$4 sm:$0xff]   ;;  %v1080_v21 = vld [vmem:[%s1432_s5 + $0x130] ss:$28 sps:$4 sm:$0xff]   ;;  %v1081_v23 = vld [vmem:[%s1432_s5 + $0x160] ss:$28 sps:$4 sm:$0xff]  }
  0x35   :  { %v1084_v24 = vld [vmem:[%s1432_s5 + $0x168] ss:$28 sps:$4 sm:$0xff]   ;;  %v1087_v25 = vld [vmem:[%s1432_s5 + $0x19c] ss:$28 sps:$4 sm:$0xff]  }
  0x36   :  { %653 = vmatpush1.bf16.msra.mxu0 %v1033_v28  ;;  %v1085_v26 = vld [vmem:[%s1432_s5 + $0x198] ss:$28 sps:$4 sm:$0xff]   ;;  %v1088_v27 = vld [vmem:[%s1432_s5 + $0x1a0] ss:$28 sps:$4 sm:$0xff]   ;;  %v321_v28 = vlaneseq  ;;  %s1116_s5 = smov [#allocation2]  }
  0x37   :  { %654 = vmatprep.subr.bf16.mxu0 %v1041_v29 }
  0x38   :  { %v322_v29 = vshrl.u32 %v321_v28, 7 }
  0x3a   :  { %655 = vmatpush1.bf16.msra.mxu0 %v1039_v30  ;;  %v323_v30 = vsub.s32 0, %v322_v29 }
  0x3b   :  { %656 = vmatprep.subr.bf16.mxu0 %v1047_v31  ;;  %v331_v31 = vsub.s32 2, %v322_v29 }
  0x3e   :  { %657 = vmatpush1.bf16.msra.mxu0 %v1045_v32  ;;  %v319_v32 = vld [vmem:[%s1433_s6] sm:$0xff]  ;;  %s820_s6 = sshll.u32 %s1116_s5, 4  ;;  %s821_s6 = int_to_ptr.vmem [resolvable:$true] %s820_s6 }
  0x3f   :  { %658 = vmatprep.subr.bf16.mxu0 %v1053_v54  ;;  %s1089_s18 = scalar_lea.vmem %s821_s6, 896  ;;  %p1094_p1 = scmp.lt.s32.totalorder %s821_s6, %s821_s6 }
  0x40   :  { %p1090_p0 = scmp.ne.s32.totalorder %s821_s6, %s1089_s18  ;;  %p1095_p2 = scmp.lt.s32.totalorder %s1089_s18, %s1089_s18 }
  0x42   :  { %659 = vmatpush1.bf16.msra.mxu0 %v1051_v56  ;;  %p1096_p3 = por %p1095_p2, %p1094_p1 }
  0x43   :  { %726 = vmatprep.subr.bf16.mxu0 %v1059_v58 }
  0x44   :  { %p1097_p4 = pnand %p1096_p3, %p1090_p0 }
  0xf4   :  { %v134_v34 = vpop.f32.mrb[0].mxu0 }
  0xf5   :  { %v135_v35 = vadd.f32 %v828_v33, %v134_v34  ;;  %v947_v36 = vpop.f32.mrb[1].mxu0  ;;  %v327_v33 = vsub.s32 1, %v322_v29  ;;  %v335_v34 = vsub.s32 3, %v322_v29 }
  0xf6   :  { %v137_v37 = vpop.f32.mrb[2].mxu0  ;;  %v332_v36 = vrot.slane %v319_v32, %v331_v31 }
  0xf7   :  { %v140_v38 = vmax.f32 %v135_v35, 0.0  ;;  %v948_v39 = vpop.f32.mrb[3].mxu0  ;;  %v324_v35 = vrot.slane %v319_v32, %v323_v30  ;;  %v328_v37 = vrot.slane %v319_v32, %v327_v33 }
  0xf9   :  { %v141_v41 = vpack.c.bf16 %v140_v38, %v140_v38  ;;  %v336_v38 = vrot.slane %v319_v32, %v335_v34 }
  0xfb   :  { %966 = vmatmul.mubr.bf16.vlgmr.msra.gmra.mrb[0].mxu1 %v141_v41 }
  0xfc   :  { %686 = vmatpush1.bf16.msra.mxu1 %v1012_v40  ;;  %717 = vmatprep.mubr.bf16.mxu1 %v1115_v59 }
  0xfd   :  { %687 = vmatprep.subr.bf16.mxu1 %v1020_v42 }
 0x100   :  { %688 = vmatpush1.bf16.msra.mxu1 %v1018_v43 }
 0x101   :  { %689 = vmatprep.subr.bf16.mxu1 %v1026_v44 }
 0x104   :  { %690 = vmatpush1.bf16.msra.mxu1 %v1024_v45 }
 0x105   :  { %691 = vmatprep.subr.bf16.mxu1 %v1032_v46 }
 0x108   :  { %692 = vmatpush1.bf16.msra.mxu1 %v1030_v47 }
 0x109   :  { %693 = vmatprep.subr.bf16.mxu1 %v1038_v48 }
 0x10c   :  { %694 = vmatpush1.bf16.msra.mxu1 %v1036_v49 }
 0x10d   :  { %695 = vmatprep.subr.bf16.mxu1 %v1044_v50  ;;  %v339_v50 = vsub.s32 4, %v322_v29 }
 0x110   :  { %696 = vmatpush1.bf16.msra.mxu1 %v1042_v51  ;;  %v347_v51 = vsub.s32 6, %v322_v29 }
 0x111   :  { %697 = vmatprep.subr.bf16.mxu1 %v1050_v52  ;;  %v343_v52 = vsub.s32 5, %v322_v29 }
 0x112   :  { %v348_v54 = vrot.slane %v319_v32, %v347_v51 }
 0x114   :  { %698 = vmatpush1.bf16.msra.mxu1 %v1048_v53  ;;  %v340_v53 = vrot.slane %v319_v32, %v339_v50 }
 0x115   :  { %699 = vmatprep.subr.bf16.mxu1 %v1056_v55  ;;  %v344_v55 = vrot.slane %v319_v32, %v343_v52 }
 0x118   :  { %700 = vmatpush1.bf16.msra.mxu1 %v1054_v57 }
 0x119   :  { %969 = vmatprep.subr.bf16.mxu1 %v1113_v1 }
 0x1ce   :  { %v247_v61 = vpop.f32.mrb[0].mxu1 }
 0x1cf   :  { %v248_v62 = vadd.f32 %v837_v60, %v247_v61  ;;  %v967_v63 = vpop.f32.mrb[1].mxu1 }
 0x1d0   :  { %v250_v0 = vpop.f32.mrb[2].mxu1 }
 0x1d1   :  { %v253_v2 = vmax.f32 %v248_v62, 0.0  ;;  %v968_v3 = vpop.f32.mrb[3].mxu1 }
 0x1d3   :  { %v254_v6 = vpack.c.bf16 %v253_v2, %v253_v2 }
 0x1d5   :  { %677 = vmatmul.mubr.bf16.vlgmr.msra.gmra.mrb[4].mxu0 %v254_v6  ;;  %718 = vmatmul.mubr.bf16.vlgmr.msra.gmra.mrb[4].mxu1 %v254_v6 }
 0x1d6   :  { %727 = vmatpush1.bf16.msra.mxu0 %v1057_v4  ;;  %970 = vmatpush3.bf16.msra.mxu1 %v1060_v5 }
 0x1d7   :  { %728 = vmatprep.subr.bf16.mxu0 %v1063_v7  ;;  %971 = vmatprep.subr.bf16.mxu1 %v1113_v1 }
 0x1d8   :  { %758 = vmatprep.mubr.bf16.mxu0 %v1115_v59  ;;  %985 = vmatprep.mubr.msk.bf16.mxu1 %vm1114_vm0, %v1113_v1 }
 0x1da   :  { %729 = vmatpush1.bf16.msra.mxu0 %v1061_v8  ;;  %972 = vmatpush3.bf16.msra.mxu1 %v1064_v9 }
 0x1db   :  { %730 = vmatprep.subr.bf16.mxu0 %v1067_v10  ;;  %973 = vmatprep.subr.bf16.mxu1 %v1113_v1 }
 0x1de   :  { %731 = vmatpush1.bf16.msra.mxu0 %v1065_v11  ;;  %974 = vmatpush3.bf16.msra.mxu1 %v1068_v12 }
 0x1df   :  { %732 = vmatprep.subr.bf16.mxu0 %v1071_v13  ;;  %975 = vmatprep.subr.bf16.mxu1 %v1113_v1 }
 0x1e2   :  { %733 = vmatpush1.bf16.msra.mxu0 %v1069_v14  ;;  %976 = vmatpush3.bf16.msra.mxu1 %v1072_v15 }
 0x1e3   :  { %734 = vmatprep.subr.bf16.mxu0 %v1075_v16  ;;  %977 = vmatprep.subr.bf16.mxu1 %v1113_v1 }
 0x1e6   :  { %735 = vmatpush1.bf16.msra.mxu0 %v1073_v17  ;;  %978 = vmatpush3.bf16.msra.mxu1 %v1076_v18 }
 0x1e7   :  { %736 = vmatprep.subr.bf16.mxu0 %v1079_v19  ;;  %979 = vmatprep.subr.bf16.mxu1 %v1113_v1 }
 0x1ea   :  { %737 = vmatpush1.bf16.msra.mxu0 %v1077_v20  ;;  %980 = vmatpush3.bf16.msra.mxu1 %v1080_v21 }
 0x1eb   :  { %738 = vmatprep.subr.bf16.mxu0 %v1083_v22  ;;  %981 = vmatprep.subr.bf16.mxu1 %v1113_v1 }
 0x1ee   :  { %739 = vmatpush1.bf16.msra.mxu0 %v1081_v23  ;;  %982 = vmatpush3.bf16.msra.mxu1 %v1084_v24 }
 0x1ef   :  { %740 = vmatprep.subr.bf16.mxu0 %v1087_v25  ;;  %983 = vmatprep.subr.bf16.mxu1 %v1113_v1 }
 0x1f2   :  { %741 = vmatpush1.bf16.msra.mxu0 %v1085_v26  ;;  %984 = vmatpush3.bf16.msra.mxu1 %v1088_v27 }
 0x1f5   :  { %759 = vmatmul.mubr.bf16.vlgmr.msra.gmra.mrb[8].mxu0 %v254_v6  ;;  %986 = vmatmul.mubr.bf16.vlgmr.msra.gmra.mrb[8].mxu1 %v254_v6 }
 0x2a8   :  { %v678_v39 = vpop.f32.mrb[4].mxu0  ;;  %v719_v1 = vpop.f32.mrb[4].mxu1 }
 0x2a9   :  { %v679_v40 = vadd.f32 %v678_v39, %v324_v35  ;;  %v720_v41 = vadd.f32 %v719_v1, %v332_v36  ;;  %v680_v42 = vpop.f32.mrb[5].mxu0  ;;  %v721_v43 = vpop.f32.mrb[5].mxu1 }
 0x2aa   :  { %v681_v44 = vadd.f32 %v680_v42, %v328_v37  ;;  %v722_v45 = vadd.f32 %v721_v43, %v336_v38  ;;  %v682_v46 = vpop.f32.mrb[6].mxu0  ;;  %v723_v47 = vpop.f32.mrb[6].mxu1 }
 0x2ab   :  { %807 = vst [vmem:[#allocation2] sm:$0xff] %v679_v40  ;;  %809 = vst [vmem:[#allocation2 + $0x10] sm:$0xff] %v720_v41  ;;  %v683_v48 = vpop.f32.mrb[7].mxu0  ;;  %v724_v49 = vpop.f32.mrb[7].mxu1 }
 0x2ac   :  { %808 = vst [vmem:[#allocation2 + $0x8] sm:$0xff] %v681_v44  ;;  %810 = vst [vmem:[#allocation2 + $0x18] sm:$0xff] %v722_v45 }
 0x2c8   :  { %v760_v56 = vpop.f32.mrb[8].mxu0  ;;  %v801_v57 = vpop.f32.mrb[8].mxu1 }
 0x2c9   :  { %v761_v58 = vadd.f32 %v760_v56, %v340_v53  ;;  %v802_v59 = vadd.f32 %v801_v57, %v348_v54  ;;  %v762_v60 = vpop.f32.mrb[9].mxu0  ;;  %v987_v61 = vpop.f32.mrb[9].mxu1 }
 0x2ca   :  { %v763_v62 = vadd.f32 %v762_v60, %v344_v55  ;;  %v764_v63 = vpop.f32.mrb[10].mxu0  ;;  %v804_v0 = vpop.f32.mrb[10].mxu1 }
 0x2cb   :  { %811 = vst [vmem:[#allocation2 + $0x20] sm:$0xff] %v761_v58  ;;  %813 = vst [vmem:[#allocation2 + $0x30] sm:$0xff] %v802_v59  ;;  %v765_v2 = vpop.f32.mrb[11].mxu0  ;;  %v988_v3 = vpop.f32.mrb[11].mxu1 }
 0x2cc   :  { %812 = vst [vmem:[#allocation2 + $0x28] sm:$0xff] %v763_v62 }
 0x2cd   :  { %1100 = shalt.err (!%p1097_p4)
}
 0x2ce   :  { %s1101_s2 = scalar_lea.hbm %s1434_s7, 896 }
 0x2cf   :  { %p1102_p5 = scmp.ne.s32.totalorder %s1434_s7, %s1101_s2  ;;  %p1105_p6 = scmp.lt.u32.totalorder %s1101_s2, %s1434_s7 }
 0x2d1   :  { %p1107_p7 = pnand %p1105_p6, %p1102_p5 }
 0x2d3   :  { %1110 = shalt.err (!%p1107_p7)
}
 0x2d4   :  { %823 = dma.vmem_to_hbm [thread:$0]  %s821_s6, 896, %s1434_s7, [#allocation3]  }
 0x2d5   :  { %1111 = dma.done.wait [#allocation3], 896  }
 0x2d6   :  { %1112 = vsyncadd [#allocation3], 4294966400 }
 0x2d7   :  { %827 = vsyncpa [#allocation3], 1 }

</bundles_post_ra>
